<compile_context>
chip_gen: v5e
topology: v5e:2x2
jax: 0.10.0
libtpu: 0.0.40
codegen_flags: <defaults>
</compile_context>

<pallas_src>
import jax
import jax.numpy as jnp
from jax import lax
from jax.experimental import pallas as pl
from jax.experimental.pallas import tpu as pltpu

_SUBLANE = 8


def _round_up(n, m):
    return ((n + m - 1) // m) * m


def _vmem_capacity_bytes():
    """Physical VMEM per TensorCore; conservative v7x default if unknown."""
    try:
        return int(pltpu.get_tpu_info().vmem_capacity_bytes)
    except Exception:
        return 64 << 20


def _feat_consistency_kernel(x_ref, w1_ref, b1_ref, w3_ref, b3_ref, o_ref):
    # Weights are pre-transposed to [K, N]; contract dim 1 of the LHS with
    # dim 0 of the RHS (MXU-native, no in-kernel layout conversion).
    dn = (((1,), (0,)), ((), ()))
    # F1: Linear(feature_dim -> channel_out), f32 accumulation on the MXU.
    h = lax.dot_general(x_ref[...], w1_ref[...], dn,
                        preferred_element_type=jnp.float32)
    # F2: bias-add + ReLU in f32 on the VPU.
    h = jnp.maximum(h + b1_ref[...], 0.0)
    # F3: Linear (channel_out == feature_dim).  Cast h to the weight dtype so
    # bf16 deployments run the MXU at full rate; accumulation stays f32.
    o = lax.dot_general(h.astype(w3_ref.dtype), w3_ref[...], dn,
                        preferred_element_type=jnp.float32)
    o_ref[...] = (o + b3_ref[...]).astype(o_ref.dtype)


def prepare_feat_consistency_params(w1, b1, w3, b3, *, compute_dtype=None):
    """One-time (offline, outside the hot path) weight/bias preparation.

    w1, w3: PyTorch nn.Linear weights in (out, in) layout; b1, b3: (out,).
    Returns weights transposed to MXU-native (in, out) = [K, N] layout, cast
    to `compute_dtype` if given (biases stay f32 for the f32 epilogue).
    """
    C, D = w1.shape
    assert w3.shape == (C, D) and b1.shape == (C,) and b3.shape == (C,)
    assert C == D, (
        "Linear -> ReLU -> Linear chain requires channel_out == feature_dim")
    if compute_dtype is not None:
        w1 = w1.astype(compute_dtype)
        w3 = w3.astype(compute_dtype)
    w1p = w1.T                                   # (D, C): [K, N]
    w3p = w3.T                                   # (D, C): [K, N]
    b1p = b1.astype(jnp.float32).reshape(1, C)
    b3p = b3.astype(jnp.float32).reshape(1, C)
    return w1p, b1p, w3p, b3p


def _vmem_estimate(bb, D, C, x_isz, w_isz, out_isz, weight_bufs):
    tiles = 2 * bb * D * x_isz + 2 * bb * C * out_isz   # double-buffered x/out
    weights = weight_bufs * 2 * D * C * w_isz            # W1 + W3 resident
    biases = weight_bufs * 2 * C * 4                     # f32 biases
    return tiles + weights + biases


def feat_consistency_forward(x, params, *, block_b=None):
    """x: (B, feature_dim).  Returns (B, channel_out) in x's dtype."""
    w1p, b1p, w3p, b3p = params
    D, C = w1p.shape
    assert x.ndim == 2 and x.shape[1] == D, (x.shape, (D, C))
    B = x.shape[0]

    out_dtype = x.dtype
    if x.dtype != w1p.dtype:
        # Compute dtype is baked into the prepared params; cast x to match so
        # the MXU sees homogeneous operands (accumulation is f32 regardless).
        x = x.astype(w1p.dtype)
    x_isz = jnp.dtype(x.dtype).itemsize
    w_isz = jnp.dtype(w1p.dtype).itemsize
    out_isz = jnp.dtype(out_dtype).itemsize

    vmem_cap = _vmem_capacity_bytes()
    budget = (3 * vmem_cap) // 4            # ~48 MiB on v7x, ~96 MiB on v5e/v6e
    hard_cap = vmem_cap - (8 << 20)         # never request all of physical VMEM

    # Batch tile: grow toward the VMEM budget but keep >= ~4 grid steps when B
    # allows it (pipelining + v7x dual-TensorCore sharding of the parallel axis).
    if block_b is None:
        block_b = 2048
    block_b = min(block_b, _round_up(pl.cdiv(B, 4), _SUBLANE))
    block_b = max(_SUBLANE, _round_up(block_b, _SUBLANE))
    while (_vmem_estimate(block_b, D, C, x_isz, w_isz, out_isz, 1) > budget
           and block_b > _SUBLANE):
        block_b = max(_SUBLANE, _round_up(block_b // 2, _SUBLANE))

    # Size the limit for double-buffered weights so the fallback path below
    # also fits; still capped well under physical capacity.
    est = _vmem_estimate(block_b, D, C, x_isz, w_isz, out_isz, 2)
    vmem_limit = int(min(hard_cap, max(32 << 20, est + (8 << 20))))

    grid = (pl.cdiv(B, block_b),)           # non-divisible B -> Pallas edge handling

    def run(single_buffer_weights):
        const_kwargs = ({"pipeline_mode": pl.Buffered(1)}
                        if single_buffer_weights else {})
        in_specs = [
            pl.BlockSpec((block_b, D), lambda i: (i, 0)),             # x tile
            pl.BlockSpec((D, C), lambda i: (0, 0), **const_kwargs),   # W1 [K,N]
            pl.BlockSpec((1, C), lambda i: (0, 0), **const_kwargs),   # b1
            pl.BlockSpec((D, C), lambda i: (0, 0), **const_kwargs),   # W3 [K,N]
            pl.BlockSpec((1, C), lambda i: (0, 0), **const_kwargs),   # b3
        ]
        out_specs = pl.BlockSpec((block_b, C), lambda i: (i, 0))
        return pl.pallas_call(
            _feat_consistency_kernel,
            out_shape=jax.ShapeDtypeStruct((B, C), out_dtype),
            grid_spec=pltpu.PrefetchScalarGridSpec(
                num_scalar_prefetch=0,
                grid=grid,
                in_specs=in_specs,
                out_specs=out_specs,
            ),
            compiler_params=pltpu.CompilerParams(
                dimension_semantics=("parallel",),
                vmem_limit_bytes=vmem_limit,
            ),
        )(x, w1p, b1p, w3p, b3p)

    try:
        return run(True)
    except Exception:
        # pl.Buffered(1) single-buffering unavailable on this jax/Mosaic
        # version; fall back to default double-buffered constant operands.
        return run(False)


def _torch_linear_init(key, in_dim, out_dim):
    kw, kb = jax.random.split(key)
    bound = 1.0 / (in_dim ** 0.5)
    w = jax.random.uniform(kw, (out_dim, in_dim), minval=-bound, maxval=bound,
                           dtype=jnp.float32)
    b = jax.random.uniform(kb, (out_dim,), minval=-bound, maxval=bound,
                           dtype=jnp.float32)
    return w, b


def _reference(x, w1, b1, w3, b3):
    return jnp.maximum(x @ w1.T + b1, 0.0) @ w3.T + b3


if __name__ == "__main__":
    key = jax.random.PRNGKey(0)
    k_small, k_big, kx1, kx2 = jax.random.split(key, 4)

    # --- Test 1: tiny shapes (single grid step), exact f32 check. ----------
    B1, dim1 = 8, 32                      # feature_dim == channel_out
    w1a, b1a = _torch_linear_init(jax.random.fold_in(k_small, 0), dim1, dim1)
    w3a, b3a = _torch_linear_init(jax.random.fold_in(k_small, 1), dim1, dim1)
    x1 = jax.random.normal(kx1, (B1, dim1), dtype=jnp.float32)

    params1 = prepare_feat_consistency_params(w1a, b1a, w3a, b3a)
    out1 = jax.block_until_ready(feat_consistency_forward(x1, params1))
    ref1 = _reference(x1, w1a, b1a, w3a, b3a)
    assert out1.shape == (B1, dim1)
    assert jnp.allclose(out1, ref1, atol=1e-5, rtol=1e-5)

    # --- Test 2: multi-step grid with a partial final block, f32. ----------
    B2, dim2 = 123, 128                   # 123 = 3*32 + 27 -> ragged last tile
    w1b, b1b = _torch_linear_init(jax.random.fold_in(k_big, 0), dim2, dim2)
    w3b, b3b = _torch_linear_init(jax.random.fold_in(k_big, 1), dim2, dim2)
    x2 = jax.random.normal(kx2, (B2, dim2), dtype=jnp.float32)

    params2 = prepare_feat_consistency_params(w1b, b1b, w3b, b3b)
    out2 = jax.block_until_ready(
        feat_consistency_forward(x2, params2, block_b=32))   # grid = 4 steps
    ref2 = _reference(x2, w1b, b1b, w3b, b3b)
    assert out2.shape == (B2, dim2)
    assert jnp.allclose(out2, ref2, atol=1e-4, rtol=1e-5)

    # --- Test 3: bf16 operands, f32 accumulation (bandwidth-bound path). ---
    params3 = prepare_feat_consistency_params(
        w1b, b1b, w3b, b3b, compute_dtype=jnp.bfloat16)
    out3 = jax.block_until_ready(
        feat_consistency_forward(x2, params3, block_b=32))
    assert out3.shape == (B2, dim2)
    assert jnp.allclose(out3, ref2, atol=7.5e-2, rtol=7.5e-2)

    print("KERNEL_OK")
</pallas_src>

<mosaic_0001>
module attributes {stable_mosaic.version = 11 : i64} {
  func.func @_feat_consistency_kernel(%arg0: i32, %arg1: memref<8x32xf32, #tpu.memory_space<vmem>>, %arg2: memref<32x32xf32, #tpu.memory_space<vmem>>, %arg3: memref<1x32xf32, #tpu.memory_space<vmem>>, %arg4: memref<32x32xf32, #tpu.memory_space<vmem>>, %arg5: memref<1x32xf32, #tpu.memory_space<vmem>>, %arg6: memref<8x32xf32, #tpu.memory_space<vmem>>) attributes {dimension_semantics = [#tpu.dimension_semantics<parallel>], iteration_bounds = array<i64: 1>, scalar_prefetch = 0 : i64, scratch_operands = 0 : i64, tpu.core_type = #tpu.core_type<tc>, window_params = [{transform_indices = @transform_0, window_bounds = array<i64: 8, 32>}, {pipeline_mode = #tpu.pipeline_mode<synchronous>, transform_indices = @transform_1, window_bounds = array<i64: 32, 32>}, {pipeline_mode = #tpu.pipeline_mode<synchronous>, transform_indices = @transform_2, window_bounds = array<i64: 1, 32>}, {pipeline_mode = #tpu.pipeline_mode<synchronous>, transform_indices = @transform_3, window_bounds = array<i64: 32, 32>}, {pipeline_mode = #tpu.pipeline_mode<synchronous>, transform_indices = @transform_4, window_bounds = array<i64: 1, 32>}, {transform_indices = @transform_5, window_bounds = array<i64: 8, 32>}]} {
    %c0 = arith.constant 0 : index
    %c0_0 = arith.constant 0 : index
    %0 = vector.load %arg1[%c0, %c0_0] : memref<8x32xf32, #tpu.memory_space<vmem>>, vector<8x32xf32>
    %c0_1 = arith.constant 0 : index
    %c0_2 = arith.constant 0 : index
    %1 = vector.load %arg2[%c0_1, %c0_2] : memref<32x32xf32, #tpu.memory_space<vmem>>, vector<32x32xf32>
    %cst = arith.constant dense<0.000000e+00> : vector<8x32xf32>
    %2 = tpu.matmul %0, %1, %cst {dimension_numbers = #tpu.dot_dimension_numbers<[1], [0], [0], [1], [0, 0, 1, 1], [], []>} : vector<8x32xf32>, vector<32x32xf32>, vector<8x32xf32> -> vector<8x32xf32>
    %c0_3 = arith.constant 0 : index
    %c0_4 = arith.constant 0 : index
    %3 = vector.load %arg3[%c0_3, %c0_4] : memref<1x32xf32, #tpu.memory_space<vmem>>, vector<1x32xf32>
    %4 = vector.broadcast %3 : vector<1x32xf32> to vector<8x32xf32>
    %5 = arith.addf %2, %4 : vector<8x32xf32>
    %cst_5 = arith.constant 0.000000e+00 : f32
    %6 = vector.broadcast %cst_5 : f32 to vector<8x32xf32>
    %7 = arith.maximumf %5, %6 : vector<8x32xf32>
    %c0_6 = arith.constant 0 : index
    %c0_7 = arith.constant 0 : index
    %8 = vector.load %arg4[%c0_6, %c0_7] : memref<32x32xf32, #tpu.memory_space<vmem>>, vector<32x32xf32>
    %cst_8 = arith.constant dense<0.000000e+00> : vector<8x32xf32>
    %9 = tpu.matmul %7, %8, %cst_8 {dimension_numbers = #tpu.dot_dimension_numbers<[1], [0], [0], [1], [0, 0, 1, 1], [], []>} : vector<8x32xf32>, vector<32x32xf32>, vector<8x32xf32> -> vector<8x32xf32>
    %c0_9 = arith.constant 0 : index
    %c0_10 = arith.constant 0 : index
    %10 = vector.load %arg5[%c0_9, %c0_10] : memref<1x32xf32, #tpu.memory_space<vmem>>, vector<1x32xf32>
    %11 = vector.broadcast %10 : vector<1x32xf32> to vector<8x32xf32>
    %12 = arith.addf %9, %11 : vector<8x32xf32>
    %c0_11 = arith.constant 0 : index
    %c0_12 = arith.constant 0 : index
    %13 = vector.load %arg6[%c0_11, %c0_12] : memref<8x32xf32, #tpu.memory_space<vmem>>, vector<8x32xf32>
    tpu.vector_store %arg6[%c0_11, %c0_12], %12 {strides = array<i32>} : memref<8x32xf32, #tpu.memory_space<vmem>>, vector<8x32xf32>,
    return
  }
  func.func @transform_0(%arg0: i32) -> (i32, i32) {
    %c0_i32 = arith.constant 0 : i32
    %c0_i32_0 = arith.constant 0 : i32
    return %arg0, %c0_i32 : i32, i32
  }
  func.func @transform_1(%arg0: i32) -> (i32, i32) {
    %c0_i32 = arith.constant 0 : i32
    %c0_i32_0 = arith.constant 0 : i32
    %c0_i32_1 = arith.constant 0 : i32
    return %c0_i32, %c0_i32_0 : i32, i32
  }
  func.func @transform_2(%arg0: i32) -> (i32, i32) {
    %c0_i32 = arith.constant 0 : i32
    %c0_i32_0 = arith.constant 0 : i32
    %c0_i32_1 = arith.constant 0 : i32
    return %c0_i32, %c0_i32_0 : i32, i32
  }
  func.func @transform_3(%arg0: i32) -> (i32, i32) {
    %c0_i32 = arith.constant 0 : i32
    %c0_i32_0 = arith.constant 0 : i32
    %c0_i32_1 = arith.constant 0 : i32
    return %c0_i32, %c0_i32_0 : i32, i32
  }
  func.func @transform_4(%arg0: i32) -> (i32, i32) {
    %c0_i32 = arith.constant 0 : i32
    %c0_i32_0 = arith.constant 0 : i32
    %c0_i32_1 = arith.constant 0 : i32
    return %c0_i32, %c0_i32_0 : i32, i32
  }
  func.func @transform_5(%arg0: i32) -> (i32, i32) {
    %c0_i32 = arith.constant 0 : i32
    %c0_i32_0 = arith.constant 0 : i32
    return %arg0, %c0_i32 : i32, i32
  }
}

module attributes {stable_mosaic.version = 11 : i64} {
  func.func @_feat_consistency_kernel(%arg0: i32, %arg1: memref<8x32xf32, #tpu.memory_space<vmem>>, %arg2: memref<32x32xf32, #tpu.memory_space<vmem>>, %arg3: memref<1x32xf32, #tpu.memory_space<vmem>>, %arg4: memref<32x32xf32, #tpu.memory_space<vmem>>, %arg5: memref<1x32xf32, #tpu.memory_space<vmem>>, %arg6: memref<8x32xf32, #tpu.memory_space<vmem>>) attributes {dimension_semantics = [#tpu.dimension_semantics<parallel>], iteration_bounds = array<i64: 1>, scalar_prefetch = 0 : i64, scratch_operands = 0 : i64, tpu.core_type = #tpu.core_type<tc>, window_params = [{transform_indices = @transform_0, window_bounds = array<i64: 8, 32>}, {pipeline_mode = #tpu.pipeline_mode<synchronous>, transform_indices = @transform_1, window_bounds = array<i64: 32, 32>}, {pipeline_mode = #tpu.pipeline_mode<synchronous>, transform_indices = @transform_2, window_bounds = array<i64: 1, 32>}, {pipeline_mode = #tpu.pipeline_mode<synchronous>, transform_indices = @transform_3, window_bounds = array<i64: 32, 32>}, {pipeline_mode = #tpu.pipeline_mode<synchronous>, transform_indices = @transform_4, window_bounds = array<i64: 1, 32>}, {transform_indices = @transform_5, window_bounds = array<i64: 8, 32>}]} {
    %c0 = arith.constant 0 : index
    %c0_0 = arith.constant 0 : index
    %0 = vector.load %arg1[%c0, %c0_0] : memref<8x32xf32, #tpu.memory_space<vmem>>, vector<8x32xf32>
    %c0_1 = arith.constant 0 : index
    %c0_2 = arith.constant 0 : index
    %1 = vector.load %arg2[%c0_1, %c0_2] : memref<32x32xf32, #tpu.memory_space<vmem>>, vector<32x32xf32>
    %cst = arith.constant dense<0.000000e+00> : vector<8x32xf32>
    %2 = tpu.matmul %0, %1, %cst {dimension_numbers = #tpu.dot_dimension_numbers<[1], [0], [0], [1], [0, 0, 1, 1], [], []>} : vector<8x32xf32>, vector<32x32xf32>, vector<8x32xf32> -> vector<8x32xf32>
    %c0_3 = arith.constant 0 : index
    %c0_4 = arith.constant 0 : index
    %3 = vector.load %arg3[%c0_3, %c0_4] : memref<1x32xf32, #tpu.memory_space<vmem>>, vector<1x32xf32>
    %4 = vector.broadcast %3 : vector<1x32xf32> to vector<8x32xf32>
    %5 = arith.addf %2, %4 : vector<8x32xf32>
    %cst_5 = arith.constant 0.000000e+00 : f32
    %6 = vector.broadcast %cst_5 : f32 to vector<8x32xf32>
    %7 = arith.maximumf %5, %6 : vector<8x32xf32>
    %c0_6 = arith.constant 0 : index
    %c0_7 = arith.constant 0 : index
    %8 = vector.load %arg4[%c0_6, %c0_7] : memref<32x32xf32, #tpu.memory_space<vmem>>, vector<32x32xf32>
    %cst_8 = arith.constant dense<0.000000e+00> : vector<8x32xf32>
    %9 = tpu.matmul %7, %8, %cst_8 {dimension_numbers = #tpu.dot_dimension_numbers<[1], [0], [0], [1], [0, 0, 1, 1], [], []>} : vector<8x32xf32>, vector<32x32xf32>, vector<8x32xf32> -> vector<8x32xf32>
    %c0_9 = arith.constant 0 : index
    %c0_10 = arith.constant 0 : index
    %10 = vector.load %arg5[%c0_9, %c0_10] : memref<1x32xf32, #tpu.memory_space<vmem>>, vector<1x32xf32>
    %11 = vector.broadcast %10 : vector<1x32xf32> to vector<8x32xf32>
    %12 = arith.addf %9, %11 : vector<8x32xf32>
    %c0_11 = arith.constant 0 : index
    %c0_12 = arith.constant 0 : index
    %13 = vector.load %arg6[%c0_11, %c0_12] : memref<8x32xf32, #tpu.memory_space<vmem>>, vector<8x32xf32>
    tpu.vector_store %arg6[%c0_11, %c0_12], %12 {strides = array<i32>} : memref<8x32xf32, #tpu.memory_space<vmem>>, vector<8x32xf32>,
    return
  }
  func.func @transform_0(%arg0: i32) -> (i32, i32) {
    %c0_i32 = arith.constant 0 : i32
    %c0_i32_0 = arith.constant 0 : i32
    return %arg0, %c0_i32 : i32, i32
  }
  func.func @transform_1(%arg0: i32) -> (i32, i32) {
    %c0_i32 = arith.constant 0 : i32
    %c0_i32_0 = arith.constant 0 : i32
    %c0_i32_1 = arith.constant 0 : i32
    return %c0_i32, %c0_i32_0 : i32, i32
  }
  func.func @transform_2(%arg0: i32) -> (i32, i32) {
    %c0_i32 = arith.constant 0 : i32
    %c0_i32_0 = arith.constant 0 : i32
    %c0_i32_1 = arith.constant 0 : i32
    return %c0_i32, %c0_i32_0 : i32, i32
  }
  func.func @transform_3(%arg0: i32) -> (i32, i32) {
    %c0_i32 = arith.constant 0 : i32
    %c0_i32_0 = arith.constant 0 : i32
    %c0_i32_1 = arith.constant 0 : i32
    return %c0_i32, %c0_i32_0 : i32, i32
  }
  func.func @transform_4(%arg0: i32) -> (i32, i32) {
    %c0_i32 = arith.constant 0 : i32
    %c0_i32_0 = arith.constant 0 : i32
    %c0_i32_1 = arith.constant 0 : i32
    return %c0_i32, %c0_i32_0 : i32, i32
  }
  func.func @transform_5(%arg0: i32) -> (i32, i32) {
    %c0_i32 = arith.constant 0 : i32
    %c0_i32_0 = arith.constant 0 : i32
    return %arg0, %c0_i32 : i32, i32
  }
}

</mosaic_0001>

<bundles_post_ra>
// kernel: tpu_custom_call.1
= control target key start
LH: loop header
LB: loop body
LE: loop exit
PB: predicated region body
PF: predicated region fallthrough
CT: control target
= control target key end

     0   :  { %10 = vsyncpa [#allocation3], 0  ;;  %s319_s0 = inlined_call_operand.hbm [shape: f32[8,32], index: 0, kind: input, shape index: {}]   ;;  %s320_s1 = inlined_call_operand.hbm [shape: f32[32,32], index: 1, kind: input, shape index: {}]   ;;  %s321_s2 = inlined_call_operand.vmem [shape: f32[1,32], index: 2, kind: input, shape index: {}]   ;;  %s322_s3 = inlined_call_operand.hbm [shape: f32[32,32], index: 3, kind: input, shape index: {}]   ;;  %s323_s4 = inlined_call_operand.vmem [shape: f32[1,32], index: 4, kind: input, shape index: {}]   ;;  %s324_s5 = inlined_call_operand.hbm [shape: f32[8,32], index: 5, kind: output, shape index: {}]  }
   0x1   :  { %11 = vsyncpa [#allocation6], 0  ;;  %s28_s20 = sshll.u32 %s320_s1, 4  ;;  %s29_s20 = int_to_ptr.hbm [resolvable:$true] %s28_s20 }
   0x2   :  { %12 = vsyncpa [#allocation4], 0  ;;  %s262_s21 = smov [#allocation5]   ;;  %s18_s25 = sshll.u32 %s319_s0, 4  ;;  %s19_s25 = int_to_ptr.hbm [resolvable:$true] %s18_s25 }
   0x3   :  { %s30_s22 = sshll.u32 %s262_s21, 4  ;;  %s263_s26 = smov 128   ;;  %s31_s22 = int_to_ptr.vmem [resolvable:$true] %s30_s22 }
   0x4   :  { %s264_s27 = smov 8   ;;  %s265_s28 = smov [#allocation2]  }
   0x5   :  { %36 = dma.hbm_to_vmem [thread:$0]  %s29_s20, 512, %s31_s22, [#allocation6], %s263_s26, %s263_s26, %s264_s27  }
   0x6   :  { %s20_s29 = sshll.u32 %s265_s28, 4  ;;  %s43_s7 = sshll.u32 %s322_s3, 4  ;;  %s21_s29 = int_to_ptr.vmem [resolvable:$true] %s20_s29  ;;  %s44_s7 = int_to_ptr.hbm [resolvable:$true] %s43_s7 }
   0x7   :  { %23 = dma.hbm_to_vmem [thread:$0]  %s19_s25, 128, %s21_s29, [#allocation3]  }
   0x8   :  { %s266_s1 = smov [#allocation7]  }
   0x9   :  { %s45_s8 = sshll.u32 %s266_s1, 4  ;;  %s46_s8 = int_to_ptr.vmem [resolvable:$true] %s45_s8 }
   0xa   :  { %51 = dma.hbm_to_vmem [thread:$0]  %s44_s7, 512, %s46_s8, [#allocation6], %s263_s26, %s263_s26, %s264_s27  }
   0xb   :  { %256 = dma.done.wait [#allocation3], 128  }
   0xc   :  { %257 = vsyncadd [#allocation3], 4294967168 }
   0xd   :  { %258 = dma.done.wait [#allocation6], 1024  }
   0xe   :  { %259 = vsyncadd [#allocation6], 4294966272  ;;  %v70_v0 = vld [vmem:[#allocation5 + $0x18] sm:$0xff]  ;;  %v69_v1 = vld [vmem:[#allocation5 + $0x10] sm:$0xff]  ;;  %vm75_vm0 = vcmask 261120   ;;  %s267_s11 = smov [#allocation8]  }
   0xf   :  { %91 = vmatpush.msra.mxu0 %v70_v0  ;;  %v103_v2 = vld [vmem:[#allocation7 + $0x18] sm:$0xff]  ;;  %v68_v3 = vld [vmem:[#allocation5 + $0x8] sm:$0xff]  ;;  %v67_v4 = vld [vmem:[#allocation5] sm:$0xff]  ;;  %s137_s12 = sshll.u32 %s267_s11, 4  ;;  %s139_s15 = sshll.u32 %s324_s5, 4  ;;  %s138_s12 = int_to_ptr.vmem [resolvable:$true] %s137_s12  ;;  %s140_s15 = int_to_ptr.hbm [resolvable:$true] %s139_s15 }
  0x10   :  { %123 = vmatpush.msra.mxu1 %v103_v2  ;;  %v66_v5 = vld [vmem:[#allocation2] sm:$0xff]  ;;  %v102_v6 = vld [vmem:[#allocation7 + $0x10] sm:$0xff]  ;;  %v101_v7 = vld [vmem:[#allocation7 + $0x8] sm:$0xff] }
  0x11   :  { %92 = vmatpush.msra.mxu0 %v69_v1  ;;  %v100_v8 = vld [vmem:[#allocation7] sm:$0xff]  ;;  %v158_v9 = vld [vmem:[%s321_s2] ss:$0 sm:$0xff] }
  0x12   :  { %124 = vmatpush.msra.mxu1 %v102_v6  ;;  %v159_v13 = vld [vmem:[%s323_s4] ss:$0 sm:$0xff] }
  0x13   :  { %93 = vmatpush.msra.mxu0 %v68_v3 }
  0x14   :  { %125 = vmatpush.msra.mxu1 %v101_v7 }
  0x15   :  { %94 = vmatpush.msra.mxu0 %v67_v4 }
  0x16   :  { %150 = vmatmul.msk.f32.vlgmr.msra.gmra.mxu0 %vm75_vm0, %v66_v5  ;;  %126 = vmatpush.msra.mxu1 %v100_v8 }
  0x93   :  { %v96_v10 = vpop.f32.mrf.mxu0 }
  0x94   :  { %v97_v11 = vadd.f32 %v158_v9, %v96_v10 }
  0x96   :  { %v99_v12 = vmax.f32 %v97_v11, 0.0 }
  0x98   :  { %151 = vmatmul.msk.f32.vlgmr.msra.gmra.mxu1 %vm75_vm0, %v99_v12 }
 0x115   :  { %v128_v14 = vpop.f32.mrf.mxu1 }
 0x116   :  { %v129_v15 = vadd.f32 %v159_v13, %v128_v14 }
 0x118   :  { %131 = vst.msk [vmem:[#allocation8] sm:$0xff] %vm75_vm0, %v129_v15 }
 0x119   :  { %142 = dma.vmem_to_hbm [thread:$0]  %s138_s12, 128, %s140_s15, [#allocation4]  }
 0x11a   :  { %260 = dma.done.wait [#allocation4], 128  }
 0x11b   :  { %261 = vsyncadd [#allocation4], 4294967168 }
 0x11c   :  { %147 = vsyncpa [#allocation3], 1 }
 0x11d   :  { %148 = vsyncpa [#allocation6], 1 }
 0x11e   :  { %149 = vsyncpa [#allocation4], 1 }

// kernel: tpu_custom_call.1
= control target key start
LH: loop header
LB: loop body
LE: loop exit
PB: predicated region body
PF: predicated region fallthrough
CT: control target
= control target key end

     0   :  { %10 = vsyncpa [#allocation3], 0  ;;  %s319_s0 = inlined_call_operand.hbm [shape: f32[8,32], index: 0, kind: input, shape index: {}]   ;;  %s320_s1 = inlined_call_operand.hbm [shape: f32[32,32], index: 1, kind: input, shape index: {}]   ;;  %s321_s2 = inlined_call_operand.vmem [shape: f32[1,32], index: 2, kind: input, shape index: {}]   ;;  %s322_s3 = inlined_call_operand.hbm [shape: f32[32,32], index: 3, kind: input, shape index: {}]   ;;  %s323_s4 = inlined_call_operand.vmem [shape: f32[1,32], index: 4, kind: input, shape index: {}]   ;;  %s324_s5 = inlined_call_operand.hbm [shape: f32[8,32], index: 5, kind: output, shape index: {}]  }
   0x1   :  { %11 = vsyncpa [#allocation6], 0  ;;  %s28_s20 = sshll.u32 %s320_s1, 4  ;;  %s29_s20 = int_to_ptr.hbm [resolvable:$true] %s28_s20 }
   0x2   :  { %12 = vsyncpa [#allocation4], 0  ;;  %s262_s21 = smov [#allocation5]   ;;  %s18_s25 = sshll.u32 %s319_s0, 4  ;;  %s19_s25 = int_to_ptr.hbm [resolvable:$true] %s18_s25 }
   0x3   :  { %s30_s22 = sshll.u32 %s262_s21, 4  ;;  %s263_s26 = smov 128   ;;  %s31_s22 = int_to_ptr.vmem [resolvable:$true] %s30_s22 }
   0x4   :  { %s264_s27 = smov 8   ;;  %s265_s28 = smov [#allocation2]  }
   0x5   :  { %36 = dma.hbm_to_vmem [thread:$0]  %s29_s20, 512, %s31_s22, [#allocation6], %s263_s26, %s263_s26, %s264_s27  }
   0x6   :  { %s20_s29 = sshll.u32 %s265_s28, 4  ;;  %s43_s7 = sshll.u32 %s322_s3, 4  ;;  %s21_s29 = int_to_ptr.vmem [resolvable:$true] %s20_s29  ;;  %s44_s7 = int_to_ptr.hbm [resolvable:$true] %s43_s7 }
   0x7   :  { %23 = dma.hbm_to_vmem [thread:$0]  %s19_s25, 128, %s21_s29, [#allocation3]  }
   0x8   :  { %s266_s1 = smov [#allocation7]  }
   0x9   :  { %s45_s8 = sshll.u32 %s266_s1, 4  ;;  %s46_s8 = int_to_ptr.vmem [resolvable:$true] %s45_s8 }
   0xa   :  { %51 = dma.hbm_to_vmem [thread:$0]  %s44_s7, 512, %s46_s8, [#allocation6], %s263_s26, %s263_s26, %s264_s27  }
   0xb   :  { %256 = dma.done.wait [#allocation3], 128  }
   0xc   :  { %257 = vsyncadd [#allocation3], 4294967168 }
   0xd   :  { %258 = dma.done.wait [#allocation6], 1024  }
   0xe   :  { %259 = vsyncadd [#allocation6], 4294966272  ;;  %v70_v0 = vld [vmem:[#allocation5 + $0x18] sm:$0xff]  ;;  %v69_v1 = vld [vmem:[#allocation5 + $0x10] sm:$0xff]  ;;  %vm75_vm0 = vcmask 261120   ;;  %s267_s11 = smov [#allocation8]  }
   0xf   :  { %91 = vmatpush.msra.mxu0 %v70_v0  ;;  %v103_v2 = vld [vmem:[#allocation7 + $0x18] sm:$0xff]  ;;  %v68_v3 = vld [vmem:[#allocation5 + $0x8] sm:$0xff]  ;;  %v67_v4 = vld [vmem:[#allocation5] sm:$0xff]  ;;  %s137_s12 = sshll.u32 %s267_s11, 4  ;;  %s139_s15 = sshll.u32 %s324_s5, 4  ;;  %s138_s12 = int_to_ptr.vmem [resolvable:$true] %s137_s12  ;;  %s140_s15 = int_to_ptr.hbm [resolvable:$true] %s139_s15 }
  0x10   :  { %123 = vmatpush.msra.mxu1 %v103_v2  ;;  %v66_v5 = vld [vmem:[#allocation2] sm:$0xff]  ;;  %v102_v6 = vld [vmem:[#allocation7 + $0x10] sm:$0xff]  ;;  %v101_v7 = vld [vmem:[#allocation7 + $0x8] sm:$0xff] }
  0x11   :  { %92 = vmatpush.msra.mxu0 %v69_v1  ;;  %v100_v8 = vld [vmem:[#allocation7] sm:$0xff]  ;;  %v158_v9 = vld [vmem:[%s321_s2] ss:$0 sm:$0xff] }
  0x12   :  { %124 = vmatpush.msra.mxu1 %v102_v6  ;;  %v159_v13 = vld [vmem:[%s323_s4] ss:$0 sm:$0xff] }
  0x13   :  { %93 = vmatpush.msra.mxu0 %v68_v3 }
  0x14   :  { %125 = vmatpush.msra.mxu1 %v101_v7 }
  0x15   :  { %94 = vmatpush.msra.mxu0 %v67_v4 }
  0x16   :  { %150 = vmatmul.msk.f32.vlgmr.msra.gmra.mxu0 %vm75_vm0, %v66_v5  ;;  %126 = vmatpush.msra.mxu1 %v100_v8 }
  0x93   :  { %v96_v10 = vpop.f32.mrf.mxu0 }
  0x94   :  { %v97_v11 = vadd.f32 %v158_v9, %v96_v10 }
  0x96   :  { %v99_v12 = vmax.f32 %v97_v11, 0.0 }
  0x98   :  { %151 = vmatmul.msk.f32.vlgmr.msra.gmra.mxu1 %vm75_vm0, %v99_v12 }
 0x115   :  { %v128_v14 = vpop.f32.mrf.mxu1 }
 0x116   :  { %v129_v15 = vadd.f32 %v159_v13, %v128_v14 }
 0x118   :  { %131 = vst.msk [vmem:[#allocation8] sm:$0xff] %vm75_vm0, %v129_v15 }
 0x119   :  { %142 = dma.vmem_to_hbm [thread:$0]  %s138_s12, 128, %s140_s15, [#allocation4]  }
 0x11a   :  { %260 = dma.done.wait [#allocation4], 128  }
 0x11b   :  { %261 = vsyncadd [#allocation4], 4294967168 }
 0x11c   :  { %147 = vsyncpa [#allocation3], 1 }
 0x11d   :  { %148 = vsyncpa [#allocation6], 1 }
 0x11e   :  { %149 = vsyncpa [#allocation4], 1 }

</bundles_post_ra>
